<compile_context>
chip_gen: v7x
topology: tpu7x:2x2x1
jax: 0.10.0
libtpu: 0.0.40
codegen_flags: <defaults>
</compile_context>

<pallas_src>
import jax
import jax.numpy as jnp
from jax.experimental import pallas as pl
from jax.experimental.pallas import tpu as pltpu


# ----------------------------- Pallas kernel -------------------------------
def stem_kernel(p_ref, w_ref, b_ref, o_ref):
    # (63, 81) bf16 @ (81, TSP) bf16 -> (63, TSP) f32 on the MXU.
    # Result is already in the lane-dense output layout; no transpose needed.
    acc = jnp.dot(w_ref[...], p_ref[...], preferred_element_type=jnp.float32)
    o_ref[...] = jnp.maximum(acc + b_ref[...], 0.0).astype(o_ref.dtype)


# ------------------------------- JAX glue ----------------------------------
def _im2col_kmajor(x_nchw, d, Ho, Wo):
    """Dilated 3x3 / stride-2 patches, K-major, straight from NCHW.

    Returns (N, 27, Ho*Wo) with K ordered (kh*3 + kw)*Cin + cin, matching the
    OIHW -> (21, 27) weight reshape below.  Built without any NHWC transpose.
    """
    N, C, H, W = x_nchw.shape
    xp = jnp.pad(x_nchw, ((0, 0), (0, 0), (d, d), (d, d)))
    taps = []
    for kh in range(3):
        for kw in range(3):
            hs = kh * d
            ws = kw * d
            taps.append(
                xp[:, :, hs:hs + 2 * (Ho - 1) + 1:2, ws:ws + 2 * (Wo - 1) + 1:2]
            )                                          # (N, C, Ho, Wo)
    t = jnp.stack(taps, axis=1)                        # (N, 9, C, Ho, Wo)
    return t.reshape(N, 9 * C, Ho * Wo)


@jax.jit
def stem_forward(x, params):
    N, Cin, H, W = x.shape
    assert Cin == 3
    Ho = (H - 1) // 2 + 1
    Wo = (W - 1) // 2 + 1
    HoWo = Ho * Wo
    Kb = Cin * 9             # 27 per branch
    K = 3 * Kb               # 81 fused
    Cout = 63

    # Spatial tile: as large as reasonable (amortize ~0.35us/step overhead).
    # Small/medium images: one full-extent tile (no padding -> zero-copy out).
    # Large images: pad Ho*Wo to a 512 multiple and pick the largest 512*k
    # tile (k<=8) that divides it, so every grid step is lane-dense.
    if HoWo <= 4096:
        TSP = HoWo
        HoWo_pad = HoWo
    else:
        HoWo_pad = pl.cdiv(HoWo, 512) * 512
        q = HoWo_pad // 512
        TSP = 512 * max(k for k in range(1, 9) if q % k == 0)
    n_sp = HoWo_pad // TSP

    # bf16 BEFORE building patches: all im2col intermediates move half the
    # bytes.  Taps are pure gathers, so numerics are identical to casting late.
    x_bf16 = x.astype(jnp.bfloat16)

    # K-major patches for all three dilations, concatenated along K: (N, 81, M)
    patches = jnp.concatenate(
        [_im2col_kmajor(x_bf16, d, Ho, Wo) for d in (1, 2, 5)], axis=1)
    if HoWo_pad != HoWo:
        patches = jnp.pad(patches, ((0, 0), (0, 0), (0, HoWo_pad - HoWo)))

    # Block-diagonal fused weight, already transposed: (63, 81).
    # Per-branch K ordering (kh, kw, cin) matches the patch layout above.
    w_bd = jnp.zeros((Cout, K), jnp.float32)
    for i in range(3):
        w = params[f"w{i + 1}"]                                    # (21,3,3,3) OIHW
        wm = jnp.transpose(w, (0, 2, 3, 1)).reshape(21, Kb)        # (21, 27)
        w_bd = w_bd.at[i * 21:(i + 1) * 21, i * Kb:(i + 1) * Kb].set(wm)
    w_bd = w_bd.astype(jnp.bfloat16)

    bias = jnp.concatenate(
        [params["b1"], params["b2"], params["b3"]]).reshape(Cout, 1)
    bias = bias.astype(jnp.float32)

    out = pl.pallas_call(
        stem_kernel,
        out_shape=jax.ShapeDtypeStruct((N, Cout, HoWo_pad), jnp.float32),
        grid=(N, n_sp),
        in_specs=[
            pl.BlockSpec((None, K, TSP), lambda n, s: (n, 0, s)),   # patches
            pl.BlockSpec((Cout, K), lambda n, s: (0, 0)),           # weight (resident)
            pl.BlockSpec((Cout, 1), lambda n, s: (0, 0)),           # bias (resident)
        ],
        out_specs=pl.BlockSpec((None, Cout, TSP), lambda n, s: (n, 0, s)),
        compiler_params=pltpu.CompilerParams(
            dimension_semantics=("parallel", "parallel")),
    )(patches, w_bd, bias)

    # Padded spatial tail holds ReLU(bias) garbage -> must be sliced off.
    if HoWo_pad != HoWo:
        out = out[:, :, :HoWo]
    # Metadata-only reshape back to NCHW; no transpose, no HBM round trip.
    return out.reshape(N, Cout, Ho, Wo)


# -------------------------- pure-JAX reference ------------------------------
def stem_reference(x, params):
    outs = []
    for i, d in zip((1, 2, 3), (1, 2, 5)):
        w = params[f"w{i}"]
        y = jax.lax.conv_general_dilated(
            x, w, window_strides=(2, 2), padding=[(d, d), (d, d)],
            rhs_dilation=(d, d),
            dimension_numbers=("NCHW", "OIHW", "NCHW"))
        y = y + params[f"b{i}"][None, :, None, None]
        outs.append(y)
    return jax.nn.relu(jnp.concatenate(outs, axis=1))


# ---------------------------------- main ------------------------------------
if __name__ == "__main__":
    key = jax.random.PRNGKey(0)
    kx, k1, k2, k3, kb1, kb2, kb3 = jax.random.split(key, 7)

    # Small but consistent shapes: N=2, Cin=3 (required by module), 16x16 spatial.
    x = jax.random.normal(kx, (2, 3, 16, 16), dtype=jnp.float32)

    params = {
        "w1": 0.1 * jax.random.normal(k1, (21, 3, 3, 3), dtype=jnp.float32),
        "w2": 0.1 * jax.random.normal(k2, (21, 3, 3, 3), dtype=jnp.float32),
        "w3": 0.1 * jax.random.normal(k3, (21, 3, 3, 3), dtype=jnp.float32),
        "b1": 0.1 * jax.random.normal(kb1, (21,), dtype=jnp.float32),
        "b2": 0.1 * jax.random.normal(kb2, (21,), dtype=jnp.float32),
        "b3": 0.1 * jax.random.normal(kb3, (21,), dtype=jnp.float32),
    }

    out = stem_forward(x, params)
    out = jax.block_until_ready(out)

    ref = stem_reference(x, params)
    assert out.shape == (2, 63, 8, 8), out.shape
    # bf16 inputs on the MXU (f32 accumulate) -> loosened tolerance vs f32 ref.
    assert jnp.allclose(out, ref, atol=5e-2, rtol=5e-2), "mismatch vs reference"

    print("KERNEL_OK")
</pallas_src>

<mosaic_0001>
module attributes {stable_mosaic.version = 11 : i64} {
  func.func @stem_kernel(%arg0: i32, %arg1: i32, %arg2: memref<1x81x64xbf16, #tpu.memory_space<vmem>>, %arg3: memref<63x81xbf16, #tpu.memory_space<vmem>>, %arg4: memref<63x1xf32, #tpu.memory_space<vmem>>, %arg5: memref<1x63x64xf32, #tpu.memory_space<vmem>>) attributes {dimension_semantics = [#tpu.dimension_semantics<parallel>, #tpu.dimension_semantics<parallel>], iteration_bounds = array<i64: 2, 1>, scalar_prefetch = 0 : i64, scratch_operands = 0 : i64, tpu.core_type = #tpu.core_type<tc>, window_params = [{transform_indices = @transform_0, window_bounds = array<i64: 1, 81, 64>}, {pipeline_mode = #tpu.pipeline_mode<synchronous>, transform_indices = @transform_1, window_bounds = array<i64: 63, 81>}, {pipeline_mode = #tpu.pipeline_mode<synchronous>, transform_indices = @transform_2, window_bounds = array<i64: 63, 1>}, {transform_indices = @transform_3, window_bounds = array<i64: 1, 63, 64>}]} {
    %c0 = arith.constant 0 : index
    %c0_0 = arith.constant 0 : index
    %0 = vector.load %arg3[%c0, %c0_0] : memref<63x81xbf16, #tpu.memory_space<vmem>>, vector<63x81xbf16>
    %c0_1 = arith.constant 0 : index
    %c0_2 = arith.constant 0 : index
    %c0_3 = arith.constant 0 : index
    %1 = vector.load %arg2[%c0_1, %c0_2, %c0_3] : memref<1x81x64xbf16, #tpu.memory_space<vmem>>, vector<1x81x64xbf16>
    %2 = vector.shape_cast %1 : vector<1x81x64xbf16> to vector<81x64xbf16>
    %cst = arith.constant dense<0.000000e+00> : vector<63x64xf32>
    %3 = tpu.matmul %0, %2, %cst {dimension_numbers = #tpu.dot_dimension_numbers<[1], [0], [0], [1], [0, 0, 1, 1], [], []>} : vector<63x81xbf16>, vector<81x64xbf16>, vector<63x64xf32> -> vector<63x64xf32>
    %c0_4 = arith.constant 0 : index
    %c0_5 = arith.constant 0 : index
    %4 = vector.load %arg4[%c0_4, %c0_5] : memref<63x1xf32, #tpu.memory_space<vmem>>, vector<63x1xf32>
    %5 = vector.broadcast %4 : vector<63x1xf32> to vector<63x64xf32>
    %6 = arith.addf %3, %5 : vector<63x64xf32>
    %cst_6 = arith.constant 0.000000e+00 : f32
    %7 = vector.broadcast %cst_6 : f32 to vector<63x64xf32>
    %8 = arith.maximumf %6, %7 : vector<63x64xf32>
    %c0_7 = arith.constant 0 : index
    %c0_8 = arith.constant 0 : index
    %c0_9 = arith.constant 0 : index
    %9 = vector.load %arg5[%c0_7, %c0_8, %c0_9] : memref<1x63x64xf32, #tpu.memory_space<vmem>>, vector<1x63x64xf32>
    %10 = vector.shape_cast %9 : vector<1x63x64xf32> to vector<63x64xf32>
    %11 = vector.shape_cast %8 : vector<63x64xf32> to vector<1x63x64xf32>
    tpu.vector_store %arg5[%c0_7, %c0_8, %c0_9], %11 {strides = array<i32>} : memref<1x63x64xf32, #tpu.memory_space<vmem>>, vector<1x63x64xf32>,
    return
  }
  func.func @transform_0(%arg0: i32, %arg1: i32) -> (i32, i32, i32) {
    %c0_i32 = arith.constant 0 : i32
    %c0_i32_0 = arith.constant 0 : i32
    return %arg0, %c0_i32, %arg1 : i32, i32, i32
  }
  func.func @transform_1(%arg0: i32, %arg1: i32) -> (i32, i32) {
    %c0_i32 = arith.constant 0 : i32
    %c0_i32_0 = arith.constant 0 : i32
    %c0_i32_1 = arith.constant 0 : i32
    return %c0_i32, %c0_i32_0 : i32, i32
  }
  func.func @transform_2(%arg0: i32, %arg1: i32) -> (i32, i32) {
    %c0_i32 = arith.constant 0 : i32
    %c0_i32_0 = arith.constant 0 : i32
    %c0_i32_1 = arith.constant 0 : i32
    return %c0_i32, %c0_i32_0 : i32, i32
  }
  func.func @transform_3(%arg0: i32, %arg1: i32) -> (i32, i32, i32) {
    %c0_i32 = arith.constant 0 : i32
    %c0_i32_0 = arith.constant 0 : i32
    return %arg0, %c0_i32, %arg1 : i32, i32, i32
  }
}

</mosaic_0001>

<bundles_post_ra>
// kernel: stem_forward.1
= control target key start
LH: loop header
LB: loop body
LE: loop exit
PB: predicated region body
PF: predicated region fallthrough
CT: control target
= control target key end

     0   :  { %s658_s12 = smov 0   ;;  %s660_s13 = smov 0   ;;  %s751_s0 = inlined_call_operand.vmem [shape: bf16[2,81,64], index: 0, kind: input, shape index: {}]   ;;  %s752_s1 = inlined_call_operand.vmem [shape: bf16[63,81], index: 1, kind: input, shape index: {}]   ;;  %s753_s2 = inlined_call_operand.vmem [shape: f32[63,1], index: 2, kind: input, shape index: {}]   ;;  %s754_s3 = inlined_call_operand.vmem [shape: f32[2,63,64], index: 3, kind: output, shape index: {}]  }
   0x1   :  { %s662_s14 = smov 0  }
   0x2 LB: > { %s25_s15 = sadd.s32 1, %s631_s13  ;;  %p512_p0 = scmp.ge.s32.totalorder %s635_s14, 1  ;;  %s635_s14 = sphi %s662_s14, %s13_s14   ;;  %s631_s13 = sphi %s660_s13, %s756_s13   ;;  %s627_s12 = sphi %s658_s12, %s755_s12  }
   0x3   : > { %p27_p1 = scmp.ge.s32.totalorder %s25_s15, 2  ;;  %p156_p2 = scmp.lt.s32.totalorder %s635_s14, 3 }
   0x5   : > { %s758_s15 = smov (%p27_p1, %s25_s15), 0  ;;  %p157_p3 = pnand %p512_p0, %p156_p2 }
   0x6   : > { %p186_p4 = scmp.lt.s32.totalorder (!%p157_p3), %s627_s12, 1  ;;  %v609_v0 = vld [vmem:[%s752_s1] sm:$0xff] (!%p157_p3)   ;;  %vm323_vm0 = vcmask (!%p157_p3), 662528   ;;  %v637_v1 = vmov (!%p157_p3), 0   ;;  %v610_v2 = vld [vmem:[%s752_s1 + $0x10] sm:$0xff] (!%p157_p3)   ;;  %v225_v6 = vld [vmem:[%s753_s2 + $0x18] sm:$0xff] (!%p157_p3) }
   0x7   : > { %160 = sbr.rel (%p157_p3) target bundleno = 264 (0x108), region = 32  ;;  %602 = vset.pattern.permute.xlu1 (!%p157_p3), %v637_v1  ;;  %601 = vset.pattern.permute.xlu0 (!%p157_p3), %v637_v1  ;;  %v224_v3 = vld [vmem:[%s753_s2 + $0x10] sm:$0xff] (!%p157_p3)  ;;  %v222_v4 = vld [vmem:[%s753_s2] sm:$0xff] (!%p157_p3)  ;;  %v223_v8 = vld [vmem:[%s753_s2 + $0x8] sm:$0xff] (!%p157_p3)  ;;  %vm336_vm1 = vcmask (!%p157_p3), 1040384   ;;  %vm415_vm2 = vcmask (!%p157_p3), 523264  }
   0x8   : > { %555 = vmatprep.mubr.msk.bf16.mxu0 (!%p157_p3), %vm323_vm0, %v609_v0  ;;  %559 = vmatprep.mubr.msk.bf16.mxu1 (!%p157_p3), %vm323_vm0, %v610_v2  ;;  %v227_v10 = vld [vmem:[%s753_s2 + $0x28] sm:$0xff] (!%p157_p3)  ;;  %v226_v11 = vld [vmem:[%s753_s2 + $0x20] sm:$0xff] (!%p157_p3)  ;;  %v229_v13 = vld [vmem:[%s753_s2 + $0x38] sm:$0x7f] (!%p157_p3)  ;;  %v338_v17 = vsel (!%p157_p3), %vm336_vm1, 65535, %v637_v1  ;;  %vm423_vm3 = vcmask (!%p157_p3), 522240  }
   0x9   : > { %242 = vperm.xlu1 (!%p157_p3), %602, %v224_v3   ;;  %232 = vperm.xlu0 (!%p157_p3), %601, %v222_v4   ;;  %v228_v14 = vld [vmem:[%s753_s2 + $0x30] sm:$0xff] (!%p157_p3)  ;;  %v611_v19 = vld [vmem:[%s752_s1 + $0x8] sm:$0xff] (!%p157_p3)   ;;  %v612_v20 = vld [vmem:[%s752_s1 + $0x18] sm:$0xff] (!%p157_p3)  }
   0xd   : > { %247 = vperm.xlu1 (!%p157_p3), %602, %v225_v6   ;;  %237 = vperm.xlu0 (!%p157_p3), %601, %v223_v8  }
   0xe   : > { %s760_s12 = smov (!%p186_p4, %s627_s12), 1 }
   0xf   : > { %s575_s20 = smul.u32 44, %s760_s12  ;;  %s532_s21 = sshll.u32 %s760_s12, 6 }
  0x10   : > { %s201_s24 = scalar_lea.vmem %s754_s3, %s532_s21 }
  0x11   : > { %s696_s27 = scalar_lea.vmem %s751_s0, %s575_s20  ;;  %257 = vperm.xlu1 %602, %v227_v10   ;;  %252 = vperm.xlu0 %601, %v226_v11  }
  0x12   : > { %v603_v5 = vld [vmem:[%s696_s27] sm:$0xff]   ;;  %v604_v7 = vld [vmem:[%s696_s27 + $0x8] sm:$0xff]   ;;  %v605_v9 = vld [vmem:[%s696_s27 + $0x10] sm:$0xff]  }
  0x13   : > { %543 = vmatprep.subr.bf16.mxu0 %v603_v5  ;;  %563 = vmatprep.subr.bf16.mxu1 %v603_v5  ;;  %v606_v12 = vld [vmem:[%s696_s27 + $0x18] sm:$0xff]   ;;  %v607_v15 = vld [vmem:[%s696_s27 + $0x20] sm:$0xff]   ;;  %v608_v16 = vld [vmem:[%s696_s27 + $0x28] ss:$0 sps:$4 sm:$0x11]  }
  0x14   : > { %544 = vmatpush3.bf16.msra.mxu0 %v603_v5  ;;  %569 = vmatpush3.bf16.msra.mxu1 %v603_v5  ;;  %v340_v18 = vand.u32 %v608_v16, %v338_v17 }
  0x15   : > { %545 = vmatprep.subr.bf16.mxu0 %v604_v7  ;;  %564 = vmatprep.subr.bf16.mxu1 %v604_v7 }
  0x16   : > { %267 = vperm.xlu1 %602, %v229_v13   ;;  %262 = vperm.xlu0 %601, %v228_v14  }
  0x18   : > { %546 = vmatpush3.bf16.msra.mxu0 %v604_v7  ;;  %570 = vmatpush3.bf16.msra.mxu1 %v604_v7 }
  0x19   : > { %547 = vmatprep.subr.bf16.mxu0 %v605_v9  ;;  %565 = vmatprep.subr.bf16.mxu1 %v605_v9 }
  0x1c   : > { %548 = vmatpush3.bf16.msra.mxu0 %v605_v9  ;;  %571 = vmatpush3.bf16.msra.mxu1 %v605_v9 }
  0x1d   : > { %549 = vmatprep.subr.bf16.mxu0 %v606_v12  ;;  %566 = vmatprep.subr.bf16.mxu1 %v606_v12 }
  0x20   : > { %550 = vmatpush3.bf16.msra.mxu0 %v606_v12  ;;  %572 = vmatpush3.bf16.msra.mxu1 %v606_v12 }
  0x21   : > { %551 = vmatprep.subr.bf16.mxu0 %v607_v15  ;;  %567 = vmatprep.subr.bf16.mxu1 %v607_v15 }
  0x24   : > { %552 = vmatpush3.bf16.msra.mxu0 %v607_v15  ;;  %573 = vmatpush3.bf16.msra.mxu1 %v607_v15 }
  0x25   : > { %553 = vmatprep.subr.bf16.mxu0 %v340_v18  ;;  %568 = vmatprep.subr.bf16.mxu1 %v340_v18 }
  0x28   : > { %554 = vmatpush3.bf16.msra.mxu0 %v340_v18  ;;  %574 = vmatpush3.bf16.msra.mxu1 %v340_v18 }
  0x2b   : > { %556 = vmatmul.mubr.msk.bf16.vlgmr.msra.gmra.mrb[0].mxu0 %vm323_vm0, %v611_v19  ;;  %560 = vmatmul.mubr.msk.bf16.vlgmr.msra.gmra.mrb[0].mxu1 %vm323_vm0, %v612_v20 }
  0x88   : > { %v243_v21 = vpop.permute.xlu1 %242  ;;  %v233_v22 = vpop.permute.xlu0 %232 }
  0x8c   : > { %v248_v23 = vpop.permute.xlu1 %247  ;;  %v238_v24 = vpop.permute.xlu0 %237 }
  0x90   : > { %v258_v25 = vpop.permute.xlu1 %257  ;;  %v253_v26 = vpop.permute.xlu0 %252 }
  0x95   : > { %v268_v27 = vpop.permute.xlu1 %267  ;;  %v263_v28 = vpop.permute.xlu0 %262 }
  0xfe   : > { %v557_v29 = vpop.f32.mrb[0].mxu0  ;;  %v561_v30 = vpop.f32.mrb[0].mxu1 }
  0xff   : > { %v385_v31 = vadd.f32 %v557_v29, %v243_v21  ;;  %v401_v32 = vadd.f32 %v561_v30, %v263_v28  ;;  %v376_v33 = vpop.f32.mrb[1].mxu0  ;;  %v392_v34 = vpop.f32.mrb[1].mxu1 }
 0x100   : > { %v377_v35 = vadd.f32 %v376_v33, %v233_v22  ;;  %v393_v36 = vadd.f32 %v392_v34, %v253_v26  ;;  %v558_v37 = vpop.f32.mrb[2].mxu0  ;;  %v562_v38 = vpop.f32.mrb[2].mxu1 }
 0x101   : > { %v409_v39 = vmax.f32 %v385_v31, 0.0  ;;  %v413_v40 = vmax.f32 %v401_v32, 0.0  ;;  %v388_v41 = vadd.f32 %v558_v37, %v248_v23  ;;  %v404_v42 = vadd.f32 %v562_v38, %v268_v27  ;;  %v379_v43 = vpop.f32.mrb[3].mxu0  ;;  %v395_v44 = vpop.f32.mrb[3].mxu1 }
 0x102   : > { %v407_v45 = vmax.f32 %v377_v35, 0.0  ;;  %v411_v46 = vmax.f32 %v393_v36, 0.0  ;;  %v380_v47 = vadd.f32 %v379_v43, %v238_v24  ;;  %v396_v48 = vadd.f32 %v395_v44, %v258_v25 }
 0x103   : > { %418 = vst.msk [vmem:[%s201_s24 + $0x10] sm:$0xff] %vm415_vm2, %v409_v39  ;;  %422 = vst.msk [vmem:[%s201_s24 + $0x30] sm:$0xff] %vm415_vm2, %v413_v40  ;;  %v410_v49 = vmax.f32 %v388_v41, 0.0  ;;  %v414_v50 = vmax.f32 %v404_v42, 0.0 }
 0x104   : > { %416 = vst.msk [vmem:[%s201_s24] sm:$0xff] %vm415_vm2, %v407_v45  ;;  %420 = vst.msk [vmem:[%s201_s24 + $0x20] sm:$0xff] %vm415_vm2, %v411_v46  ;;  %v408_v51 = vmax.f32 %v380_v47, 0.0  ;;  %v412_v52 = vmax.f32 %v396_v48, 0.0 }
 0x105   : > { %419 = vst.msk [vmem:[%s201_s24 + $0x18] sm:$0xff] %vm415_vm2, %v410_v49 }
 0x106   : > { %424 = vst.msk [vmem:[%s201_s24 + $0x38] sm:$0x7f] %vm423_vm3, %v414_v50 }
 0x107   : > { %417 = vst.msk [vmem:[%s201_s24 + $0x8] sm:$0xff] %vm415_vm2, %v408_v51  ;;  %421 = vst.msk [vmem:[%s201_s24 + $0x28] sm:$0xff] %vm415_vm2, %v412_v52 }
 0x108 PF: > { %s13_s14 = sadd.s32 1, %s635_s14   ;;  %s755_s12 = smov %s631_s13 }
 0x109   : > { %p10_p5 = scmp.ge.s32.totalorder %s13_s14, 4   ;;  %s756_s13 = smov %s758_s15 }
 0x10b   :  { %12 = sbr.rel (!%p10_p5) target bundleno = 2 (0x2), region = 62 }

</bundles_post_ra>
